<compile_context>
chip_gen: v5e
topology: v5e:2x2
jax: 0.10.0
libtpu: 0.0.40
codegen_flags: <defaults>
</compile_context>

<pallas_src>
import math
from functools import partial

import jax
import jax.numpy as jnp
from jax import lax
from jax.experimental import pallas as pl


# ----------------------------------------------------------------------------
# In-kernel attention core for ONE batch row (Q/K/V already projected, in vregs)
# ----------------------------------------------------------------------------

def _attention_heads(q, k, v, wo_hm_ref, bo, num_heads):
    # q: [Nq, H], k/v: [Nk, H]; score scale already folded into q.
    nq, hid = q.shape
    d = hid // num_heads
    acc = jnp.zeros((nq, hid), jnp.float32)
    for h in range(num_heads):                      # static unroll over heads
        cs = slice(h * d, (h + 1) * d)
        qh, kh, vh = q[:, cs], k[:, cs], v[:, cs]
        # Q_h @ K_h^T without materializing a transpose (scale pre-folded into Q).
        s = lax.dot_general(qh, kh, (((1,), (1,)), ((), ())),
                            preferred_element_type=jnp.float32)         # [Nq, Nk]
        # clustering=True -> softmax over the QUERY axis (dim=1 of [B*heads, Nq, Nk]).
        m = jnp.max(s, axis=0, keepdims=True)
        e = jnp.exp(s - m)
        a = e / jnp.sum(e, axis=0, keepdims=True)                       # exact divide
        oh = jnp.dot(a, vh, preferred_element_type=jnp.float32)         # [Nq, d]
        # Output projection accumulated head-by-head: oh @ Wo[h*d:(h+1)*d, :]
        # (head-major Wo slice == cheap first-axis ref index; no lane concat needed).
        acc = acc + jnp.dot(oh, wo_hm_ref[h], preferred_element_type=jnp.float32)
    return acc + bo


# ----------------------------------------------------------------------------
# Fused kernels (single invocation; no grid)
# ----------------------------------------------------------------------------

def _mha_self_kernel(x_ref, wqkv_ref, bqkv_ref, wo_hm_ref, bo_ref, o_ref, *, num_heads):
    bsz, seq, hid = x_ref.shape
    # Fused QKV projection for ALL B*N rows in one [B*N, H] @ [H, 3H] matmul.
    x2 = x_ref[...].reshape(bsz * seq, hid)
    qkv = jnp.dot(x2, wqkv_ref[...], preferred_element_type=jnp.float32) + bqkv_ref[...]
    q_all, k_all, v_all = qkv[:, :hid], qkv[:, hid:2 * hid], qkv[:, 2 * hid:]
    bo = bo_ref[...]
    for b in range(bsz):                            # static unroll over batch
        rs = slice(b * seq, (b + 1) * seq)
        o_ref[b] = _attention_heads(q_all[rs], k_all[rs], v_all[rs],
                                    wo_hm_ref, bo, num_heads)


def _mha_cross_kernel(xq_ref, xk_ref, xv_ref,
                      wq_ref, bq_ref, wk_ref, bk_ref, wv_ref, bv_ref,
                      wo_hm_ref, bo_ref, o_ref, *, num_heads):
    bsz, nq, hid = xq_ref.shape
    nk = xk_ref.shape[1]
    q_all = jnp.dot(xq_ref[...].reshape(bsz * nq, hid), wq_ref[...],
                    preferred_element_type=jnp.float32) + bq_ref[...]
    k_all = jnp.dot(xk_ref[...].reshape(bsz * nk, hid), wk_ref[...],
                    preferred_element_type=jnp.float32) + bk_ref[...]
    v_all = jnp.dot(xv_ref[...].reshape(bsz * nk, hid), wv_ref[...],
                    preferred_element_type=jnp.float32) + bv_ref[...]
    bo = bo_ref[...]
    for b in range(bsz):
        o_ref[b] = _attention_heads(q_all[b * nq:(b + 1) * nq],
                                    k_all[b * nk:(b + 1) * nk],
                                    v_all[b * nk:(b + 1) * nk],
                                    wo_hm_ref, bo, num_heads)


# ----------------------------------------------------------------------------
# Wrapper == MultiHeadAttention.forward (eval mode)
# ----------------------------------------------------------------------------

def multi_head_attention(params, x_q, x_k, x_v, mask=None):
    """Equivalent of MultiHeadAttention.forward(x_q, x_k, x_v, mask) in eval mode.

    `params` must come from prepare_params()/init_params(): weight fusion, scale
    folding and the head-major Wo reshape are done there ONCE, not per call.
    """
    num_heads = params["num_heads"]
    bsz, nq, hid = x_q.shape
    assert hid % num_heads == 0

    # TODO(synk): the reference computes `inf_mask` from `mask` but never applies it to
    # the attention scores, so `mask` is intentionally unused here (exact reproduction).
    del mask

    out_shape = jax.ShapeDtypeStruct((bsz, nq, hid), jnp.float32)

    if (x_q is x_k) and (x_q is x_v):
        # Self-attention fast path (how gnnt.py's GraphTransformer calls this module).
        return pl.pallas_call(
            partial(_mha_self_kernel, num_heads=num_heads),
            out_shape=out_shape,
        )(x_q, params["w_qkv"], params["b_qkv"], params["wo_hm"], params["bo"])

    # General cross-attention path (distinct x_q / x_k / x_v), still one fused kernel.
    return pl.pallas_call(
        partial(_mha_cross_kernel, num_heads=num_heads),
        out_shape=out_shape,
    )(x_q, x_k, x_v,
      params["wq"], params["bq"], params["wk"], params["bk"],
      params["wv"], params["bv"], params["wo_hm"], params["bo"])


# ----------------------------------------------------------------------------
# Parameter preparation (hoisted out of the per-call forward path) and init
# ----------------------------------------------------------------------------

def prepare_params(raw, hidden_dim, num_heads):
    d = hidden_dim // num_heads
    scale = 1.0 / math.sqrt(hidden_dim)   # reference divides by sqrt(hidden_dim), NOT head_dim
    wq, bq = raw["wq"]
    wk, bk = raw["wk"]
    wv, bv = raw["wv"]
    wo, bo = raw["wo"]
    wq_s, bq_s = wq * scale, bq * scale    # fold the score scale into the Q projection
    return {
        "num_heads": num_heads,
        # self-attention fast path: fused [H, 3H] QKV projection (built once, here)
        "w_qkv": jnp.concatenate([wq_s, wk, wv], axis=1),
        "b_qkv": jnp.concatenate([bq_s, bk, bv], axis=1),
        # general (cross) path
        "wq": wq_s, "bq": bq_s, "wk": wk, "bk": bk, "wv": wv, "bv": bv,
        # output projection, head-major so the kernel accumulates per head (no concat)
        "wo_hm": wo.reshape(num_heads, d, hidden_dim),
        "bo": bo,
    }


def init_params(key, hidden_dim, num_heads):
    keys = iter(jax.random.split(key, 16))

    def lin_init(i, o):
        s = 1.0 / math.sqrt(i)
        w = jax.random.uniform(next(keys), (i, o), jnp.float32, -s, s)
        b = jax.random.uniform(next(keys), (1, o), jnp.float32, -s, s)
        return w, b

    raw = {
        "wq": lin_init(hidden_dim, hidden_dim),
        "wk": lin_init(hidden_dim, hidden_dim),
        "wv": lin_init(hidden_dim, hidden_dim),
        "wo": lin_init(hidden_dim, hidden_dim),
    }
    return raw, prepare_params(raw, hidden_dim, num_heads)


# ----------------------------------------------------------------------------
# Pure-JAX reference (literal translation of the PyTorch forward, eval mode)
# ----------------------------------------------------------------------------

def reference_mha(raw, x_q, x_k, x_v, num_heads, hidden_dim):
    wq, bq = raw["wq"]; wk, bk = raw["wk"]; wv, bv = raw["wv"]; wo, bo = raw["wo"]
    Q = x_q @ wq + bq
    K = x_k @ wk + bk
    V = x_v @ wv + bv
    Qh = jnp.concatenate(jnp.split(Q, num_heads, axis=2), axis=0)
    Kh = jnp.concatenate(jnp.split(K, num_heads, axis=2), axis=0)
    Vh = jnp.concatenate(jnp.split(V, num_heads, axis=2), axis=0)
    s = jnp.einsum("bqd,bkd->bqk", Qh, Kh) / math.sqrt(hidden_dim)
    A = jax.nn.softmax(s, axis=1)          # clustering=True -> softmax over query axis
    out = jnp.einsum("bqk,bkd->bqd", A, Vh)
    out = jnp.concatenate(jnp.split(out, num_heads, axis=0), axis=2)
    return out @ wo + bo


# ----------------------------------------------------------------------------

if __name__ == "__main__":
    key = jax.random.PRNGKey(0)
    bsz, seq, hidden, heads = 2, 8, 32, 4

    kp, kx, kk, kv = jax.random.split(key, 4)
    raw, params = init_params(kp, hidden, heads)

    x = jax.random.normal(kx, (bsz, seq, hidden), dtype=jnp.float32)
    mask = jnp.ones((bsz, seq), dtype=bool)   # accepted for API parity; unused (see TODO)

    # 1) self-attention fast path (GraphTransformer's usage in gnnt.py)
    out_self = multi_head_attention(params, x, x, x, mask)
    jax.block_until_ready(out_self)
    assert out_self.shape == (bsz, seq, hidden)
    assert bool(jnp.all(jnp.isfinite(out_self)))
    ref_self = reference_mha(raw, x, x, x, heads, hidden)
    assert bool(jnp.allclose(out_self, ref_self, rtol=1e-3, atol=1e-3))

    # 2) general cross-attention path (distinct q / k / v inputs)
    x_k = jax.random.normal(kk, (bsz, seq, hidden), dtype=jnp.float32)
    x_v = jax.random.normal(kv, (bsz, seq, hidden), dtype=jnp.float32)
    out_cross = multi_head_attention(params, x, x_k, x_v, mask)
    jax.block_until_ready(out_cross)
    assert out_cross.shape == (bsz, seq, hidden)
    assert bool(jnp.all(jnp.isfinite(out_cross)))
    ref_cross = reference_mha(raw, x, x_k, x_v, heads, hidden)
    assert bool(jnp.allclose(out_cross, ref_cross, rtol=1e-3, atol=1e-3))

    print("KERNEL_OK")
</pallas_src>

<mosaic_0001>
module attributes {stable_mosaic.version = 11 : i64} {
  func.func @_mha_self_kernel(%arg0: memref<2x8x32xf32, #tpu.memory_space<vmem>>, %arg1: memref<32x96xf32, #tpu.memory_space<vmem>>, %arg2: memref<1x96xf32, #tpu.memory_space<vmem>>, %arg3: memref<4x8x32xf32, #tpu.memory_space<vmem>>, %arg4: memref<1x32xf32, #tpu.memory_space<vmem>>, %arg5: memref<2x8x32xf32, #tpu.memory_space<vmem>>) attributes {dimension_semantics = [], scalar_prefetch = 0 : i64, scratch_operands = 0 : i64, tpu.core_type = #tpu.core_type<tc>} {
    %c0 = arith.constant 0 : index
    %c0_0 = arith.constant 0 : index
    %c0_1 = arith.constant 0 : index
    %0 = vector.load %arg0[%c0, %c0_0, %c0_1] : memref<2x8x32xf32, #tpu.memory_space<vmem>>, vector<2x8x32xf32>
    %1 = vector.shape_cast %0 : vector<2x8x32xf32> to vector<16x32xf32>
    %c0_2 = arith.constant 0 : index
    %c0_3 = arith.constant 0 : index
    %2 = vector.load %arg1[%c0_2, %c0_3] : memref<32x96xf32, #tpu.memory_space<vmem>>, vector<32x96xf32>
    %cst = arith.constant dense<0.000000e+00> : vector<16x96xf32>
    %3 = tpu.matmul %1, %2, %cst {dimension_numbers = #tpu.dot_dimension_numbers<[1], [0], [0], [1], [0, 0, 1, 1], [], []>} : vector<16x32xf32>, vector<32x96xf32>, vector<16x96xf32> -> vector<16x96xf32>
    %c0_4 = arith.constant 0 : index
    %c0_5 = arith.constant 0 : index
    %4 = vector.load %arg2[%c0_4, %c0_5] : memref<1x96xf32, #tpu.memory_space<vmem>>, vector<1x96xf32>
    %5 = vector.broadcast %4 : vector<1x96xf32> to vector<16x96xf32>
    %6 = arith.addf %3, %5 : vector<16x96xf32>
    %7 = vector.extract_strided_slice %6 {offsets = [0, 0], sizes = [16, 32], strides = [1, 1]} : vector<16x96xf32> to vector<16x32xf32>
    %8 = vector.extract_strided_slice %6 {offsets = [0, 32], sizes = [16, 32], strides = [1, 1]} : vector<16x96xf32> to vector<16x32xf32>
    %9 = vector.extract_strided_slice %6 {offsets = [0, 64], sizes = [16, 32], strides = [1, 1]} : vector<16x96xf32> to vector<16x32xf32>
    %c0_6 = arith.constant 0 : index
    %c0_7 = arith.constant 0 : index
    %10 = vector.load %arg4[%c0_6, %c0_7] : memref<1x32xf32, #tpu.memory_space<vmem>>, vector<1x32xf32>
    %11 = vector.extract_strided_slice %7 {offsets = [0, 0], sizes = [8, 32], strides = [1, 1]} : vector<16x32xf32> to vector<8x32xf32>
    %12 = vector.extract_strided_slice %8 {offsets = [0, 0], sizes = [8, 32], strides = [1, 1]} : vector<16x32xf32> to vector<8x32xf32>
    %13 = vector.extract_strided_slice %9 {offsets = [0, 0], sizes = [8, 32], strides = [1, 1]} : vector<16x32xf32> to vector<8x32xf32>
    %cst_8 = arith.constant 0.000000e+00 : f32
    %14 = vector.broadcast %cst_8 : f32 to vector<8x32xf32>
    %15 = vector.extract_strided_slice %11 {offsets = [0, 0], sizes = [8, 8], strides = [1, 1]} : vector<8x32xf32> to vector<8x8xf32>
    %16 = vector.extract_strided_slice %12 {offsets = [0, 0], sizes = [8, 8], strides = [1, 1]} : vector<8x32xf32> to vector<8x8xf32>
    %17 = vector.extract_strided_slice %13 {offsets = [0, 0], sizes = [8, 8], strides = [1, 1]} : vector<8x32xf32> to vector<8x8xf32>
    %cst_9 = arith.constant dense<0.000000e+00> : vector<8x8xf32>
    %18 = tpu.matmul %15, %16, %cst_9 {dimension_numbers = #tpu.dot_dimension_numbers<[1], [1], [0], [0], [0, 0, 1, 0], [], []>} : vector<8x8xf32>, vector<8x8xf32>, vector<8x8xf32> -> vector<8x8xf32>
    %cst_10 = arith.constant dense<0xFF800000> : vector<8xf32>
    %19 = vector.multi_reduction <maximumf>, %18, %cst_10 [0] : vector<8x8xf32> to vector<8xf32>
    %20 = vector.shape_cast %19 : vector<8xf32> to vector<1x8xf32>
    %21 = vector.broadcast %20 : vector<1x8xf32> to vector<8x8xf32>
    %22 = arith.subf %18, %21 : vector<8x8xf32>
    %23 = math.exp %22 : vector<8x8xf32>
    %cst_11 = arith.constant dense<0.000000e+00> : vector<8xf32>
    %24 = vector.multi_reduction <add>, %23, %cst_11 [0] : vector<8x8xf32> to vector<8xf32>
    %25 = vector.shape_cast %24 : vector<8xf32> to vector<1x8xf32>
    %26 = vector.broadcast %25 : vector<1x8xf32> to vector<8x8xf32>
    %27 = arith.divf %23, %26 : vector<8x8xf32>
    %cst_12 = arith.constant dense<0.000000e+00> : vector<8x8xf32>
    %28 = tpu.matmul %27, %17, %cst_12 {dimension_numbers = #tpu.dot_dimension_numbers<[1], [0], [0], [1], [0, 0, 1, 1], [], []>} : vector<8x8xf32>, vector<8x8xf32>, vector<8x8xf32> -> vector<8x8xf32>
    %c0_13 = arith.constant 0 : index
    %c0_14 = arith.constant 0 : index
    %c0_15 = arith.constant 0 : index
    %29 = vector.load %arg3[%c0_13, %c0_14, %c0_15] : memref<4x8x32xf32, #tpu.memory_space<vmem>>, vector<1x8x32xf32>
    %30 = vector.shape_cast %29 : vector<1x8x32xf32> to vector<8x32xf32>
    %cst_16 = arith.constant dense<0.000000e+00> : vector<8x32xf32>
    %31 = tpu.matmul %28, %30, %cst_16 {dimension_numbers = #tpu.dot_dimension_numbers<[1], [0], [0], [1], [0, 0, 1, 1], [], []>} : vector<8x8xf32>, vector<8x32xf32>, vector<8x32xf32> -> vector<8x32xf32>
    %32 = arith.addf %14, %31 : vector<8x32xf32>
    %33 = vector.extract_strided_slice %11 {offsets = [0, 8], sizes = [8, 8], strides = [1, 1]} : vector<8x32xf32> to vector<8x8xf32>
    %34 = vector.extract_strided_slice %12 {offsets = [0, 8], sizes = [8, 8], strides = [1, 1]} : vector<8x32xf32> to vector<8x8xf32>
    %35 = vector.extract_strided_slice %13 {offsets = [0, 8], sizes = [8, 8], strides = [1, 1]} : vector<8x32xf32> to vector<8x8xf32>
    %cst_17 = arith.constant dense<0.000000e+00> : vector<8x8xf32>
    %36 = tpu.matmul %33, %34, %cst_17 {dimension_numbers = #tpu.dot_dimension_numbers<[1], [1], [0], [0], [0, 0, 1, 0], [], []>} : vector<8x8xf32>, vector<8x8xf32>, vector<8x8xf32> -> vector<8x8xf32>
    %cst_18 = arith.constant dense<0xFF800000> : vector<8xf32>
    %37 = vector.multi_reduction <maximumf>, %36, %cst_18 [0] : vector<8x8xf32> to vector<8xf32>
    %38 = vector.shape_cast %37 : vector<8xf32> to vector<1x8xf32>
    %39 = vector.broadcast %38 : vector<1x8xf32> to vector<8x8xf32>
    %40 = arith.subf %36, %39 : vector<8x8xf32>
    %41 = math.exp %40 : vector<8x8xf32>
    %cst_19 = arith.constant dense<0.000000e+00> : vector<8xf32>
    %42 = vector.multi_reduction <add>, %41, %cst_19 [0] : vector<8x8xf32> to vector<8xf32>
    %43 = vector.shape_cast %42 : vector<8xf32> to vector<1x8xf32>
    %44 = vector.broadcast %43 : vector<1x8xf32> to vector<8x8xf32>
    %45 = arith.divf %41, %44 : vector<8x8xf32>
    %cst_20 = arith.constant dense<0.000000e+00> : vector<8x8xf32>
    %46 = tpu.matmul %45, %35, %cst_20 {dimension_numbers = #tpu.dot_dimension_numbers<[1], [0], [0], [1], [0, 0, 1, 1], [], []>} : vector<8x8xf32>, vector<8x8xf32>, vector<8x8xf32> -> vector<8x8xf32>
    %c1 = arith.constant 1 : index
    %c0_21 = arith.constant 0 : index
    %c0_22 = arith.constant 0 : index
    %47 = vector.load %arg3[%c1, %c0_21, %c0_22] : memref<4x8x32xf32, #tpu.memory_space<vmem>>, vector<1x8x32xf32>
    %48 = vector.shape_cast %47 : vector<1x8x32xf32> to vector<8x32xf32>
    %cst_23 = arith.constant dense<0.000000e+00> : vector<8x32xf32>
    %49 = tpu.matmul %46, %48, %cst_23 {dimension_numbers = #tpu.dot_dimension_numbers<[1], [0], [0], [1], [0, 0, 1, 1], [], []>} : vector<8x8xf32>, vector<8x32xf32>, vector<8x32xf32> -> vector<8x32xf32>
    %50 = arith.addf %32, %49 : vector<8x32xf32>
    %51 = vector.extract_strided_slice %11 {offsets = [0, 16], sizes = [8, 8], strides = [1, 1]} : vector<8x32xf32> to vector<8x8xf32>
    %52 = vector.extract_strided_slice %12 {offsets = [0, 16], sizes = [8, 8], strides = [1, 1]} : vector<8x32xf32> to vector<8x8xf32>
    %53 = vector.extract_strided_slice %13 {offsets = [0, 16], sizes = [8, 8], strides = [1, 1]} : vector<8x32xf32> to vector<8x8xf32>
    %cst_24 = arith.constant dense<0.000000e+00> : vector<8x8xf32>
    %54 = tpu.matmul %51, %52, %cst_24 {dimension_numbers = #tpu.dot_dimension_numbers<[1], [1], [0], [0], [0, 0, 1, 0], [], []>} : vector<8x8xf32>, vector<8x8xf32>, vector<8x8xf32> -> vector<8x8xf32>
    %cst_25 = arith.constant dense<0xFF800000> : vector<8xf32>
    %55 = vector.multi_reduction <maximumf>, %54, %cst_25 [0] : vector<8x8xf32> to vector<8xf32>
    %56 = vector.shape_cast %55 : vector<8xf32> to vector<1x8xf32>
    %57 = vector.broadcast %56 : vector<1x8xf32> to vector<8x8xf32>
    %58 = arith.subf %54, %57 : vector<8x8xf32>
    %59 = math.exp %58 : vector<8x8xf32>
    %cst_26 = arith.constant dense<0.000000e+00> : vector<8xf32>
    %60 = vector.multi_reduction <add>, %59, %cst_26 [0] : vector<8x8xf32> to vector<8xf32>
    %61 = vector.shape_cast %60 : vector<8xf32> to vector<1x8xf32>
    %62 = vector.broadcast %61 : vector<1x8xf32> to vector<8x8xf32>
    %63 = arith.divf %59, %62 : vector<8x8xf32>
    %cst_27 = arith.constant dense<0.000000e+00> : vector<8x8xf32>
    %64 = tpu.matmul %63, %53, %cst_27 {dimension_numbers = #tpu.dot_dimension_numbers<[1], [0], [0], [1], [0, 0, 1, 1], [], []>} : vector<8x8xf32>, vector<8x8xf32>, vector<8x8xf32> -> vector<8x8xf32>
    %c2 = arith.constant 2 : index
    %c0_28 = arith.constant 0 : index
    %c0_29 = arith.constant 0 : index
    %65 = vector.load %arg3[%c2, %c0_28, %c0_29] : memref<4x8x32xf32, #tpu.memory_space<vmem>>, vector<1x8x32xf32>
    %66 = vector.shape_cast %65 : vector<1x8x32xf32> to vector<8x32xf32>
    %cst_30 = arith.constant dense<0.000000e+00> : vector<8x32xf32>
    %67 = tpu.matmul %64, %66, %cst_30 {dimension_numbers = #tpu.dot_dimension_numbers<[1], [0], [0], [1], [0, 0, 1, 1], [], []>} : vector<8x8xf32>, vector<8x32xf32>, vector<8x32xf32> -> vector<8x32xf32>
    %68 = arith.addf %50, %67 : vector<8x32xf32>
    %69 = vector.extract_strided_slice %11 {offsets = [0, 24], sizes = [8, 8], strides = [1, 1]} : vector<8x32xf32> to vector<8x8xf32>
    %70 = vector.extract_strided_slice %12 {offsets = [0, 24], sizes = [8, 8], strides = [1, 1]} : vector<8x32xf32> to vector<8x8xf32>
    %71 = vector.extract_strided_slice %13 {offsets = [0, 24], sizes = [8, 8], strides = [1, 1]} : vector<8x32xf32> to vector<8x8xf32>
    %cst_31 = arith.constant dense<0.000000e+00> : vector<8x8xf32>
    %72 = tpu.matmul %69, %70, %cst_31 {dimension_numbers = #tpu.dot_dimension_numbers<[1], [1], [0], [0], [0, 0, 1, 0], [], []>} : vector<8x8xf32>, vector<8x8xf32>, vector<8x8xf32> -> vector<8x8xf32>
    %cst_32 = arith.constant dense<0xFF800000> : vector<8xf32>
    %73 = vector.multi_reduction <maximumf>, %72, %cst_32 [0] : vector<8x8xf32> to vector<8xf32>
    %74 = vector.shape_cast %73 : vector<8xf32> to vector<1x8xf32>
    %75 = vector.broadcast %74 : vector<1x8xf32> to vector<8x8xf32>
    %76 = arith.subf %72, %75 : vector<8x8xf32>
    %77 = math.exp %76 : vector<8x8xf32>
    %cst_33 = arith.constant dense<0.000000e+00> : vector<8xf32>
    %78 = vector.multi_reduction <add>, %77, %cst_33 [0] : vector<8x8xf32> to vector<8xf32>
    %79 = vector.shape_cast %78 : vector<8xf32> to vector<1x8xf32>
    %80 = vector.broadcast %79 : vector<1x8xf32> to vector<8x8xf32>
    %81 = arith.divf %77, %80 : vector<8x8xf32>
    %cst_34 = arith.constant dense<0.000000e+00> : vector<8x8xf32>
    %82 = tpu.matmul %81, %71, %cst_34 {dimension_numbers = #tpu.dot_dimension_numbers<[1], [0], [0], [1], [0, 0, 1, 1], [], []>} : vector<8x8xf32>, vector<8x8xf32>, vector<8x8xf32> -> vector<8x8xf32>
    %c3 = arith.constant 3 : index
    %c0_35 = arith.constant 0 : index
    %c0_36 = arith.constant 0 : index
    %83 = vector.load %arg3[%c3, %c0_35, %c0_36] : memref<4x8x32xf32, #tpu.memory_space<vmem>>, vector<1x8x32xf32>
    %84 = vector.shape_cast %83 : vector<1x8x32xf32> to vector<8x32xf32>
    %cst_37 = arith.constant dense<0.000000e+00> : vector<8x32xf32>
    %85 = tpu.matmul %82, %84, %cst_37 {dimension_numbers = #tpu.dot_dimension_numbers<[1], [0], [0], [1], [0, 0, 1, 1], [], []>} : vector<8x8xf32>, vector<8x32xf32>, vector<8x32xf32> -> vector<8x32xf32>
    %86 = arith.addf %68, %85 : vector<8x32xf32>
    %87 = vector.broadcast %10 : vector<1x32xf32> to vector<8x32xf32>
    %88 = arith.addf %86, %87 : vector<8x32xf32>
    %c0_38 = arith.constant 0 : index
    %c0_39 = arith.constant 0 : index
    %c0_40 = arith.constant 0 : index
    %89 = vector.load %arg5[%c0_38, %c0_39, %c0_40] : memref<2x8x32xf32, #tpu.memory_space<vmem>>, vector<1x8x32xf32>
    %90 = vector.shape_cast %89 : vector<1x8x32xf32> to vector<8x32xf32>
    %91 = vector.shape_cast %88 : vector<8x32xf32> to vector<1x8x32xf32>
    tpu.vector_store %arg5[%c0_38, %c0_39, %c0_40], %91 {strides = array<i32>} : memref<2x8x32xf32, #tpu.memory_space<vmem>>, vector<1x8x32xf32>,
    %92 = vector.extract_strided_slice %7 {offsets = [8, 0], sizes = [8, 32], strides = [1, 1]} : vector<16x32xf32> to vector<8x32xf32>
    %93 = vector.extract_strided_slice %8 {offsets = [8, 0], sizes = [8, 32], strides = [1, 1]} : vector<16x32xf32> to vector<8x32xf32>
    %94 = vector.extract_strided_slice %9 {offsets = [8, 0], sizes = [8, 32], strides = [1, 1]} : vector<16x32xf32> to vector<8x32xf32>
    %cst_41 = arith.constant 0.000000e+00 : f32
    %95 = vector.broadcast %cst_41 : f32 to vector<8x32xf32>
    %96 = vector.extract_strided_slice %92 {offsets = [0, 0], sizes = [8, 8], strides = [1, 1]} : vector<8x32xf32> to vector<8x8xf32>
    %97 = vector.extract_strided_slice %93 {offsets = [0, 0], sizes = [8, 8], strides = [1, 1]} : vector<8x32xf32> to vector<8x8xf32>
    %98 = vector.extract_strided_slice %94 {offsets = [0, 0], sizes = [8, 8], strides = [1, 1]} : vector<8x32xf32> to vector<8x8xf32>
    %cst_42 = arith.constant dense<0.000000e+00> : vector<8x8xf32>
    %99 = tpu.matmul %96, %97, %cst_42 {dimension_numbers = #tpu.dot_dimension_numbers<[1], [1], [0], [0], [0, 0, 1, 0], [], []>} : vector<8x8xf32>, vector<8x8xf32>, vector<8x8xf32> -> vector<8x8xf32>
    %cst_43 = arith.constant dense<0xFF800000> : vector<8xf32>
    %100 = vector.multi_reduction <maximumf>, %99, %cst_43 [0] : vector<8x8xf32> to vector<8xf32>
    %101 = vector.shape_cast %100 : vector<8xf32> to vector<1x8xf32>
    %102 = vector.broadcast %101 : vector<1x8xf32> to vector<8x8xf32>
    %103 = arith.subf %99, %102 : vector<8x8xf32>
    %104 = math.exp %103 : vector<8x8xf32>
    %cst_44 = arith.constant dense<0.000000e+00> : vector<8xf32>
    %105 = vector.multi_reduction <add>, %104, %cst_44 [0] : vector<8x8xf32> to vector<8xf32>
    %106 = vector.shape_cast %105 : vector<8xf32> to vector<1x8xf32>
    %107 = vector.broadcast %106 : vector<1x8xf32> to vector<8x8xf32>
    %108 = arith.divf %104, %107 : vector<8x8xf32>
    %cst_45 = arith.constant dense<0.000000e+00> : vector<8x8xf32>
    %109 = tpu.matmul %108, %98, %cst_45 {dimension_numbers = #tpu.dot_dimension_numbers<[1], [0], [0], [1], [0, 0, 1, 1], [], []>} : vector<8x8xf32>, vector<8x8xf32>, vector<8x8xf32> -> vector<8x8xf32>
    %c0_46 = arith.constant 0 : index
    %c0_47 = arith.constant 0 : index
    %c0_48 = arith.constant 0 : index
    %110 = vector.load %arg3[%c0_46, %c0_47, %c0_48] : memref<4x8x32xf32, #tpu.memory_space<vmem>>, vector<1x8x32xf32>
    %111 = vector.shape_cast %110 : vector<1x8x32xf32> to vector<8x32xf32>
    %cst_49 = arith.constant dense<0.000000e+00> : vector<8x32xf32>
    %112 = tpu.matmul %109, %111, %cst_49 {dimension_numbers = #tpu.dot_dimension_numbers<[1], [0], [0], [1], [0, 0, 1, 1], [], []>} : vector<8x8xf32>, vector<8x32xf32>, vector<8x32xf32> -> vector<8x32xf32>
    %113 = arith.addf %95, %112 : vector<8x32xf32>
    %114 = vector.extract_strided_slice %92 {offsets = [0, 8], sizes = [8, 8], strides = [1, 1]} : vector<8x32xf32> to vector<8x8xf32>
    %115 = vector.extract_strided_slice %93 {offsets = [0, 8], sizes = [8, 8], strides = [1, 1]} : vector<8x32xf32> to vector<8x8xf32>
    %116 = vector.extract_strided_slice %94 {offsets = [0, 8], sizes = [8, 8], strides = [1, 1]} : vector<8x32xf32> to vector<8x8xf32>
    %cst_50 = arith.constant dense<0.000000e+00> : vector<8x8xf32>
    %117 = tpu.matmul %114, %115, %cst_50 {dimension_numbers = #tpu.dot_dimension_numbers<[1], [1], [0], [0], [0, 0, 1, 0], [], []>} : vector<8x8xf32>, vector<8x8xf32>, vector<8x8xf32> -> vector<8x8xf32>
    %cst_51 = arith.constant dense<0xFF800000> : vector<8xf32>
    %118 = vector.multi_reduction <maximumf>, %117, %cst_51 [0] : vector<8x8xf32> to vector<8xf32>
    %119 = vector.shape_cast %118 : vector<8xf32> to vector<1x8xf32>
    %120 = vector.broadcast %119 : vector<1x8xf32> to vector<8x8xf32>
    %121 = arith.subf %117, %120 : vector<8x8xf32>
    %122 = math.exp %121 : vector<8x8xf32>
    %cst_52 = arith.constant dense<0.000000e+00> : vector<8xf32>
    %123 = vector.multi_reduction <add>, %122, %cst_52 [0] : vector<8x8xf32> to vector<8xf32>
    %124 = vector.shape_cast %123 : vector<8xf32> to vector<1x8xf32>
    %125 = vector.broadcast %124 : vector<1x8xf32> to vector<8x8xf32>
    %126 = arith.divf %122, %125 : vector<8x8xf32>
    %cst_53 = arith.constant dense<0.000000e+00> : vector<8x8xf32>
    %127 = tpu.matmul %126, %116, %cst_53 {dimension_numbers = #tpu.dot_dimension_numbers<[1], [0], [0], [1], [0, 0, 1, 1], [], []>} : vector<8x8xf32>, vector<8x8xf32>, vector<8x8xf32> -> vector<8x8xf32>
    %c1_54 = arith.constant 1 : index
    %c0_55 = arith.constant 0 : index
    %c0_56 = arith.constant 0 : index
    %128 = vector.load %arg3[%c1_54, %c0_55, %c0_56] : memref<4x8x32xf32, #tpu.memory_space<vmem>>, vector<1x8x32xf32>
    %129 = vector.shape_cast %128 : vector<1x8x32xf32> to vector<8x32xf32>
    %cst_57 = arith.constant dense<0.000000e+00> : vector<8x32xf32>
    %130 = tpu.matmul %127, %129, %cst_57 {dimension_numbers = #tpu.dot_dimension_numbers<[1], [0], [0], [1], [0, 0, 1, 1], [], []>} : vector<8x8xf32>, vector<8x32xf32>, vector<8x32xf32> -> vector<8x32xf32>
    %131 = arith.addf %113, %130 : vector<8x32xf32>
    %132 = vector.extract_strided_slice %92 {offsets = [0, 16], sizes = [8, 8], strides = [1, 1]} : vector<8x32xf32> to vector<8x8xf32>
    %133 = vector.extract_strided_slice %93 {offsets = [0, 16], sizes = [8, 8], strides = [1, 1]} : vector<8x32xf32> to vector<8x8xf32>
    %134 = vector.extract_strided_slice %94 {offsets = [0, 16], sizes = [8, 8], strides = [1, 1]} : vector<8x32xf32> to vector<8x8xf32>
    %cst_58 = arith.constant dense<0.000000e+00> : vector<8x8xf32>
    %135 = tpu.matmul %132, %133, %cst_58 {dimension_numbers = #tpu.dot_dimension_numbers<[1], [1], [0], [0], [0, 0, 1, 0], [], []>} : vector<8x8xf32>, vector<8x8xf32>, vector<8x8xf32> -> vector<8x8xf32>
    %cst_59 = arith.constant dense<0xFF800000> : vector<8xf32>
    %136 = vector.multi_reduction <maximumf>, %135, %cst_59 [0] : vector<8x8xf32> to vector<8xf32>
    %137 = vector.shape_cast %136 : vector<8xf32> to vector<1x8xf32>
    %138 = vector.broadcast %137 : vector<1x8xf32> to vector<8x8xf32>
    %139 = arith.subf %135, %138 : vector<8x8xf32>
    %140 = math.exp %139 : vector<8x8xf32>
    %cst_60 = arith.constant dense<0.000000e+00> : vector<8xf32>
    %141 = vector.multi_reduction <add>, %140, %cst_60 [0] : vector<8x8xf32> to vector<8xf32>
    %142 = vector.shape_cast %141 : vector<8xf32> to vector<1x8xf32>
    %143 = vector.broadcast %142 : vector<1x8xf32> to vector<8x8xf32>
    %144 = arith.divf %140, %143 : vector<8x8xf32>
    %cst_61 = arith.constant dense<0.000000e+00> : vector<8x8xf32>
    %145 = tpu.matmul %144, %134, %cst_61 {dimension_numbers = #tpu.dot_dimension_numbers<[1], [0], [0], [1], [0, 0, 1, 1], [], []>} : vector<8x8xf32>, vector<8x8xf32>, vector<8x8xf32> -> vector<8x8xf32>
    %c2_62 = arith.constant 2 : index
    %c0_63 = arith.constant 0 : index
    %c0_64 = arith.constant 0 : index
    %146 = vector.load %arg3[%c2_62, %c0_63, %c0_64] : memref<4x8x32xf32, #tpu.memory_space<vmem>>, vector<1x8x32xf32>
    %147 = vector.shape_cast %146 : vector<1x8x32xf32> to vector<8x32xf32>
    %cst_65 = arith.constant dense<0.000000e+00> : vector<8x32xf32>
    %148 = tpu.matmul %145, %147, %cst_65 {dimension_numbers = #tpu.dot_dimension_numbers<[1], [0], [0], [1], [0, 0, 1, 1], [], []>} : vector<8x8xf32>, vector<8x32xf32>, vector<8x32xf32> -> vector<8x32xf32>
    %149 = arith.addf %131, %148 : vector<8x32xf32>
    %150 = vector.extract_strided_slice %92 {offsets = [0, 24], sizes = [8, 8], strides = [1, 1]} : vector<8x32xf32> to vector<8x8xf32>
    %151 = vector.extract_strided_slice %93 {offsets = [0, 24], sizes = [8, 8], strides = [1, 1]} : vector<8x32xf32> to vector<8x8xf32>
    %152 = vector.extract_strided_slice %94 {offsets = [0, 24], sizes = [8, 8], strides = [1, 1]} : vector<8x32xf32> to vector<8x8xf32>
    %cst_66 = arith.constant dense<0.000000e+00> : vector<8x8xf32>
    %153 = tpu.matmul %150, %151, %cst_66 {dimension_numbers = #tpu.dot_dimension_numbers<[1], [1], [0], [0], [0, 0, 1, 0], [], []>} : vector<8x8xf32>, vector<8x8xf32>, vector<8x8xf32> -> vector<8x8xf32>
    %cst_67 = arith.constant dense<0xFF800000> : vector<8xf32>
    %154 = vector.multi_reduction <maximumf>, %153, %cst_67 [0] : vector<8x8xf32> to vector<8xf32>
    %155 = vector.shape_cast %154 : vector<8xf32> to vector<1x8xf32>
    %156 = vector.broadcast %155 : vector<1x8xf32> to vector<8x8xf32>
    %157 = arith.subf %153, %156 : vector<8x8xf32>
    %158 = math.exp %157 : vector<8x8xf32>
    %cst_68 = arith.constant dense<0.000000e+00> : vector<8xf32>
    %159 = vector.multi_reduction <add>, %158, %cst_68 [0] : vector<8x8xf32> to vector<8xf32>
    %160 = vector.shape_cast %159 : vector<8xf32> to vector<1x8xf32>
    %161 = vector.broadcast %160 : vector<1x8xf32> to vector<8x8xf32>
    %162 = arith.divf %158, %161 : vector<8x8xf32>
    %cst_69 = arith.constant dense<0.000000e+00> : vector<8x8xf32>
    %163 = tpu.matmul %162, %152, %cst_69 {dimension_numbers = #tpu.dot_dimension_numbers<[1], [0], [0], [1], [0, 0, 1, 1], [], []>} : vector<8x8xf32>, vector<8x8xf32>, vector<8x8xf32> -> vector<8x8xf32>
    %c3_70 = arith.constant 3 : index
    %c0_71 = arith.constant 0 : index
    %c0_72 = arith.constant 0 : index
    %164 = vector.load %arg3[%c3_70, %c0_71, %c0_72] : memref<4x8x32xf32, #tpu.memory_space<vmem>>, vector<1x8x32xf32>
    %165 = vector.shape_cast %164 : vector<1x8x32xf32> to vector<8x32xf32>
    %cst_73 = arith.constant dense<0.000000e+00> : vector<8x32xf32>
    %166 = tpu.matmul %163, %165, %cst_73 {dimension_numbers = #tpu.dot_dimension_numbers<[1], [0], [0], [1], [0, 0, 1, 1], [], []>} : vector<8x8xf32>, vector<8x32xf32>, vector<8x32xf32> -> vector<8x32xf32>
    %167 = arith.addf %149, %166 : vector<8x32xf32>
    %168 = vector.broadcast %10 : vector<1x32xf32> to vector<8x32xf32>
    %169 = arith.addf %167, %168 : vector<8x32xf32>
    %c1_74 = arith.constant 1 : index
    %c0_75 = arith.constant 0 : index
    %c0_76 = arith.constant 0 : index
    %170 = vector.load %arg5[%c1_74, %c0_75, %c0_76] : memref<2x8x32xf32, #tpu.memory_space<vmem>>, vector<1x8x32xf32>
    %171 = vector.shape_cast %170 : vector<1x8x32xf32> to vector<8x32xf32>
    %172 = vector.shape_cast %169 : vector<8x32xf32> to vector<1x8x32xf32>
    tpu.vector_store %arg5[%c1_74, %c0_75, %c0_76], %172 {strides = array<i32>} : memref<2x8x32xf32, #tpu.memory_space<vmem>>, vector<1x8x32xf32>,
    return
  }
}

</mosaic_0001>

<bundles_post_ra>
// kernel: tpu_custom_call.1
= control target key start
LH: loop header
LB: loop body
LE: loop exit
PB: predicated region body
PF: predicated region fallthrough
CT: control target
= control target key end

     0   :  { %10 = vsyncpa [#allocation3], 0  ;;  %s1403_s0 = inlined_call_operand.hbm [shape: f32[2,8,32], index: 0, kind: input, shape index: {}]   ;;  %s1404_s1 = inlined_call_operand.hbm [shape: f32[32,96], index: 1, kind: input, shape index: {}]   ;;  %s1405_s2 = inlined_call_operand.vmem [shape: f32[1,96], index: 2, kind: input, shape index: {}]   ;;  %s1406_s3 = inlined_call_operand.hbm [shape: f32[4,8,32], index: 3, kind: input, shape index: {}]   ;;  %s1407_s4 = inlined_call_operand.vmem [shape: f32[1,32], index: 4, kind: input, shape index: {}]   ;;  %s1408_s5 = inlined_call_operand.hbm [shape: f32[2,8,32], index: 5, kind: output, shape index: {}]  }
   0x1   :  { %11 = vsyncpa [#allocation6], 0 }
   0x2   :  { %12 = vsyncpa [#allocation4], 0  ;;  %s30_s20 = sshll.u32 %s1404_s1, 4  ;;  %s1210_s21 = smov [#allocation5]   ;;  %s31_s20 = int_to_ptr.hbm [resolvable:$true] %s30_s20 }
   0x3   :  { %s32_s22 = sshll.u32 %s1210_s21, 4  ;;  %s17_s25 = sshll.u32 %s1403_s0, 4  ;;  %s33_s22 = int_to_ptr.vmem [resolvable:$true] %s32_s22  ;;  %s18_s25 = int_to_ptr.hbm [resolvable:$true] %s17_s25 }
   0x4   :  { %s1211_s26 = smov 128   ;;  %s1212_s27 = smov 8  }
   0x5   :  { %38 = dma.hbm_to_vmem [thread:$0]  %s31_s20, 512, %s33_s22, [#allocation6], %s1211_s26, %s1211_s26, %s1212_s27  }
   0x6   :  { %s1213_s28 = smov [#allocation2]   ;;  %s45_s1 = sshll.u32 %s1406_s3, 4  ;;  %s46_s1 = int_to_ptr.hbm [resolvable:$true] %s45_s1 }
   0x7   :  { %s19_s29 = sshll.u32 %s1213_s28, 4  ;;  %s1214_s0 = smov [#allocation7]   ;;  %s20_s29 = int_to_ptr.vmem [resolvable:$true] %s19_s29 }
   0x8   :  { %25 = dma.hbm_to_vmem [thread:$0]  %s18_s25, 256, %s20_s29, [#allocation3], %s1211_s26, %s1211_s26, %s1212_s27  }
   0x9   :  { %s47_s7 = sshll.u32 %s1214_s0, 4  ;;  %s48_s7 = int_to_ptr.vmem [resolvable:$true] %s47_s7 }
   0xa   :  { %53 = dma.hbm_to_vmem [thread:$0]  %s46_s1, 512, %s48_s7, [#allocation6], %s1211_s26, %s1211_s26, %s1212_s27  }
   0xb   :  { %1204 = dma.done.wait [#allocation3], 256  }
   0xc   :  { %1205 = vsyncadd [#allocation3], 4294967040 }
   0xd   :  { %1206 = dma.done.wait [#allocation6], 1024  }
   0xe   :  { %1207 = vsyncadd [#allocation6], 4294966272  ;;  %v73_v0 = vld [vmem:[#allocation5 + $0x18] sm:$0xff]  ;;  %v72_v1 = vld [vmem:[#allocation5 + $0x10] sm:$0xff]  ;;  %vm78_vm0 = vcmask 261120   ;;  %s1215_s9 = smov 56  }
   0xf   :  { %97 = vmatpush.msra.mxu0 %v73_v0  ;;  %v71_v2 = vld [vmem:[#allocation5 + $0x8] sm:$0xff]  ;;  %v70_v3 = vld [vmem:[#allocation5] sm:$0xff]  ;;  %v68_v4 = vld [vmem:[#allocation2] sm:$0xff]  ;;  %s1216_s10 = smov 120   ;;  %s1217_s11 = smov 96   ;;  %vm112_vm1 = vcmask 64512  }
  0x10   :  { %v1279_v5 = vld [vmem:[%s1405_s2] ss:$0 sm:$0xff]  ;;  %s1218_s12 = smov 80   ;;  %s1219_s13 = smov 64   ;;  %v69_v8 = vld [vmem:[#allocation2 + $0x8] sm:$0xff]  ;;  %v1294_v10 = vld [vmem:[#allocation7 + $0x8] sm:$0xff] }
  0x11   :  { %98 = vmatpush.msra.mxu0 %v72_v1  ;;  %s1220_s2 = smov 88   ;;  %s1221_s14 = smov 48  }
  0x12   :  { %s1222_s15 = smov 112   ;;  %s1223_s16 = smov 104  }
  0x13   :  { %99 = vmatpush.msra.mxu0 %v71_v2  ;;  %s1224_s17 = smov 72   ;;  %s1225_s18 = smov 40  }
  0x14   :  { %s1009_s24 = sshll.u32 %s1408_s5, 4  ;;  %s1010_s24 = int_to_ptr.hbm [resolvable:$true] %s1009_s24 }
  0x15   :  { %100 = vmatpush.msra.mxu0 %v70_v3 }
  0x16   :  { %1023 = vmatmul.msk.f32.vlgmr.msra.gmra.mxu0 %vm78_vm0, %v68_v4 }
  0x1e   :  { %1024 = vmatmul.msk.f32.gmra.mxu0 %vm78_vm0, %v69_v8 }
  0x93   :  { %v102_v6 = vpop.f32.mrf.mxu0 }
  0x94   :  { %v103_v7 = vadd.f32 %v1279_v5, %v102_v6 }
  0x96   :  { %256 = vrot.lane.b32.xlu2 %v103_v7, %s1215_s9  ;;  %196 = vrot.lane.b32.xlu1 %v103_v7, %s1216_s10 }
  0x97   :  { %110 = vrot.lane.b32.xlu0 %v103_v7, %s1217_s11 }
  0x9b   :  { %v105_v29 = vpop.f32.mrf.mxu0 }
  0x9c   :  { %v1308_v35 = vadd.f32 %v1279_v5, %v105_v29 }
  0x9e   :  { %332 = vrot.lane.b32.xlu2 %v103_v7, %s1218_s12  ;;  %169 = vrot.lane.b32.xlu1 %v103_v7, %s1219_s13 }
  0x9f   :  { %198 = vrot.lane.b32.xlu0 %v103_v7, %s1220_s2 }
  0xa6   :  { %390 = vrot.lane.b32.xlu1 %v103_v7, %s1221_s14  ;;  %560 = vrot.lane.b32.xlu2 %v1308_v35, %s1217_s11 }
  0xa7   :  { %330 = vrot.lane.b32.xlu0 %v103_v7, %s1222_s15 }
  0xae   :  { %442 = vrot.lane.b32.xlu1 %v103_v7, %s1223_s16  ;;  %618 = vrot.lane.b32.xlu2 %v1308_v35, %s1219_s13 }
  0xaf   :  { %444 = vrot.lane.b32.xlu0 %v103_v7, %s1224_s17 }
  0xb6   :  { %647 = vrot.lane.b32.xlu1 %v1308_v35, %s1220_s2  ;;  %645 = vrot.lane.b32.xlu2 %v1308_v35, %s1216_s10 }
  0xb7   :  { %502 = vrot.lane.b32.xlu0 %v103_v7, %s1225_s18 }
  0xbe   :  { %778 = vrot.lane.b32.xlu1 %v1308_v35, %s1222_s15  ;;  %891 = vrot.lane.b32.xlu2 %v1308_v35, %s1224_s17 }
  0xbf   :  { %780 = vrot.lane.b32.xlu0 %v1308_v35, %s1218_s12 }
  0xc6   :  { %705 = vrot.lane.b32.xlu1 %v1308_v35, %s1215_s9  ;;  %838 = vrot.lane.b32.xlu2 %v1308_v35, %s1221_s14 }
  0xc7   :  { %889 = vrot.lane.b32.xlu0 %v1308_v35, %s1223_s16 }
  0xcf   :  { %949 = vrot.lane.b32.xlu0 %v1308_v35, %s1225_s18 }
  0xf0   :  { %v257_v13 = vpop.permute.xlu2 %256 }
 0x108   :  { %v197_v9 = vpop.permute.xlu1 %196 }
 0x109   :  { %v111_v11 = vpop.permute.xlu0 %110 }
 0x10a   :  { %1025 = vmatpush.xpose.msk.msra.mxu1 %vm112_vm1, %v111_v11 }
 0x10d   :  { %1026 = vmatmul.msk.f32.vlgmr.msra.gmra.mxu1 %vm112_vm1, %v103_v7 }
 0x10e   :  { %302 = vmatpush.msrb.mxu1 %v1294_v10 }
 0x110   :  { %v170_v12 = vpop.permute.xlu1 %169 }
 0x111   :  { %v199_v14 = vpop.permute.xlu0 %198  ;;  %190 = vmatpush.msra.mxu2 %v170_v12 }
 0x112   :  { %1028 = vmatpush.xpose.msk.msra.mxu3 %vm112_vm1, %v199_v14 }
 0x113   :  { %277 = vmatpush.msrb.mxu2 %v257_v13 }
 0x115   :  { %1029 = vmatmul.msk.f32.vlgmr.msra.gmra.mxu3 %vm112_vm1, %v197_v9 }
 0x118   :  { %v391_v15 = vpop.permute.xlu1 %390 }
 0x119   :  { %v1301_v16 = vpop.permute.xlu0 %330  ;;  %411 = vmatpush.msra.mxu1 %v391_v15 }
 0x120   :  { %v443_v18 = vpop.permute.xlu1 %442 }
 0x121   :  { %v445_v17 = vpop.permute.xlu0 %444 }
 0x122   :  { %1037 = vmatpush.xpose.msk.msrb.mxu0 %vm112_vm1, %v445_v17 }
 0x125   :  { %1038 = vmatmul.msk.f32.vlgmr.msrb.gmra.mxu0 %vm112_vm1, %v443_v18 }
 0x18a   :  { %v134_v19 = vpop.f32.mrf.mxu1 }
 0x18b   :  { %v137_v20 = vsel %vm112_vm1, %v134_v19, -inf }
 0x18c   :  { %v138_v21 = vrot.slane %v137_v20, 4 }
 0x18e   :  { %v139_v22 = vmax.f32 %v137_v20, %v138_v21 }
 0x190   :  { %v140_v23 = vrot.slane %v139_v22, 2 }
 0x192   :  { %v141_v24 = vmax.f32 %v139_v22, %v140_v23  ;;  %v333_v22 = vpop.permute.xlu2 %332 }
 0x194   :  { %v142_v25 = vrot.slane %v141_v24, 1 }
 0x196   :  { %v143_v26 = vmax.f32 %v141_v24, %v142_v25 }
 0x198   :  { %v144_v27 = vsub.f32 %v134_v19, %v143_v26  ;;  %v221_v28 = vpop.f32.mrf.mxu3 }
 0x199   :  { %v224_v30 = vsel %vm112_vm1, %v221_v28, -inf }
 0x19a   :  { %v145_v31 = vmul.f32 1.442695, %v144_v27  ;;  %v225_v32 = vrot.slane %v224_v30, 4 }
 0x19c   :  { %1076 = vpow2.f32 %v145_v31  ;;  %v226_v33 = vmax.f32 %v224_v30, %v225_v32 }
 0x19e   :  { %v227_v34 = vrot.slane %v226_v33, 2 }
 0x1a0   :  { %v228_v36 = vmax.f32 %v226_v33, %v227_v34 }
 0x1a2   :  { %v1077_v37 = vpop.eup %1076  ;;  %v229_v38 = vrot.slane %v228_v36, 1  ;;  %v467_v39 = vpop.f32.mrf.mxu0 }
 0x1a3   :  { %v147_v40 = vsel %vm112_vm1, %v1077_v37, 0.0  ;;  %v470_v41 = vsel %vm112_vm1, %v467_v39, -inf }
 0x1a4   :  { %v148_v42 = vrot.slane %v147_v40, 4  ;;  %v230_v43 = vmax.f32 %v228_v36, %v229_v38  ;;  %v471_v44 = vrot.slane %v470_v41, 4 }
 0x1a6   :  { %v149_v45 = vadd.f32 %v148_v42, %v147_v40  ;;  %v231_v46 = vsub.f32 %v221_v28, %v230_v43  ;;  %v472_v47 = vmax.f32 %v470_v41, %v471_v44 }
 0x1a8   :  { %v150_v48 = vrot.slane %v149_v45, 2  ;;  %v232_v49 = vmul.f32 1.442695, %v231_v46  ;;  %v473_v50 = vrot.slane %v472_v47, 2 }
 0x1aa   :  { %v151_v51 = vadd.f32 %v150_v48, %v149_v45  ;;  %1078 = vpow2.f32 %v232_v49  ;;  %v474_v52 = vmax.f32 %v472_v47, %v473_v50  ;;  %v195_v49 = vld [vmem:[#allocation7] sm:$0xff] }
 0x1ab   :  { %325 = vmatpush.msrb.mxu3 %v195_v49 }
 0x1ac   :  { %v152_v53 = vrot.slane %v151_v51, 1  ;;  %v475_v54 = vrot.slane %v474_v52, 1 }
 0x1ae   :  { %v153_v55 = vadd.f32 %v152_v53, %v151_v51  ;;  %v476_v56 = vmax.f32 %v474_v52, %v475_v54 }
 0x1b0   :  { %v1079_v57 = vpop.eup %1078  ;;  %1080 = vrcp.f32 %v153_v55  ;;  %v477_v58 = vsub.f32 %v467_v39, %v476_v56  ;;  %v165_v6 = vand.u32 2147483648, %v153_v55  ;;  %v163_v9 = vand.u32 2147483647, %v153_v55  ;;  %v503_v39 = vpop.permute.xlu0 %502 }
 0x1b1   :  { %v234_v59 = vsel %vm112_vm1, %v1079_v57, 0.0  ;;  %vm159_vm3 = vweird.f32 %v153_v55 }
 0x1b2   :  { %v235_v60 = vrot.slane %v234_v59, 4  ;;  %v478_v61 = vmul.f32 1.442695, %v477_v58  ;;  %v166_v15 = vor.u32 1.1754944e-38, %v165_v6  ;;  %vm164_vm5 = vcmp.eq.f32.partialorder %v163_v9, 8.507059e+37 }
 0x1b4   :  { %v236_v62 = vadd.f32 %v235_v60, %v234_v59  ;;  %1082 = vpow2.f32 %v478_v61 }
 0x1b6   :  { %v1081_v63 = vpop.eup %1080  ;;  %v237_v0 = vrot.slane %v236_v62, 2 }
 0x1b7   :  { %v155_v1 = vmul.f32 %v1081_v63, %v153_v55  ;;  %vm160_vm2 = vweird.f32 %v1081_v63 }
 0x1b8   :  { %v238_v2 = vadd.f32 %v237_v0, %v236_v62  ;;  %vm161_vm4 = vmor %vm159_vm3, %vm160_vm2 }
 0x1b9   :  { %v156_v3 = vsub.f32 1.0, %v155_v1 }
 0x1ba   :  { %v1083_v4 = vpop.eup %1082  ;;  %v239_v5 = vrot.slane %v238_v2, 1 }
 0x1bb   :  { %v480_v7 = vsel %vm112_vm1, %v1083_v4, 0.0  ;;  %v157_v8 = vmul.f32 %v1081_v63, %v156_v3 }
 0x1bc   :  { %v240_v11 = vadd.f32 %v239_v5, %v238_v2  ;;  %v481_v12 = vrot.slane %v480_v7, 4 }
 0x1bd   :  { %v158_v13 = vadd.f32 %v1081_v63, %v157_v8 }
 0x1be   :  { %1084 = vrcp.f32 %v240_v11  ;;  %v482_v14 = vadd.f32 %v481_v12, %v480_v7  ;;  %v252_v28 = vand.u32 2147483648, %v240_v11  ;;  %v250_v30 = vand.u32 2147483647, %v240_v11 }
 0x1bf   :  { %v162_v17 = vsel %vm161_vm4, %v1081_v63, %v158_v13  ;;  %vm246_vm7 = vweird.f32 %v240_v11  ;;  %v1346_v63 = vld [vmem:[#allocation7 + $0x18] sm:$0xff] }
 0x1c0   :  { %v483_v18 = vrot.slane %v482_v14, 2  ;;  %v167_v19 = vsel %vm164_vm5, %v166_v15, %v162_v17  ;;  %v253_v32 = vor.u32 1.1754944e-38, %v252_v28  ;;  %vm251_vm9 = vcmp.eq.f32.partialorder %v250_v30, 8.507059e+37 }
 0x1c1   :  { %v168_v20 = vmul.f32 %v1077_v37, %v167_v19 }
 0x1c2   :  { %v484_v21 = vadd.f32 %v483_v18, %v482_v14 }
 0x1c3   :  { %1027 = vmatmul.msk.f32.vlgmr.msra.gmra.mxu2 %vm112_vm1, %v168_v20  ;;  %v561_v20 = vpop.permute.xlu2 %560 }
 0x1c4   :  { %v1085_v23 = vpop.eup %1084  ;;  %v485_v24 = vrot.slane %v484_v21, 1  ;;  %1033 = vmatpush.xpose.msk.msra.mxu2 %vm112_vm1, %v333_v22  ;;  %v417_v22 = vld [vmem:[#allocation7 + $0x10] sm:$0xff] }
 0x1c5   :  { %v242_v25 = vmul.f32 %v1085_v23, %v240_v11  ;;  %vm247_vm6 = vweird.f32 %v1085_v23  ;;  %436 = vmatpush.msra.mxu3 %v417_v22 }
 0x1c6   :  { %v486_v26 = vadd.f32 %v485_v24, %v484_v21  ;;  %vm248_vm8 = vmor %vm246_vm7, %vm247_vm6  ;;  %v648_v21 = vpop.permute.xlu1 %647 }
 0x1c7   :  { %v243_v27 = vsub.f32 1.0, %v242_v25 }
 0x1c8   :  { %1086 = vrcp.f32 %v486_v26  ;;  %v498_v43 = vand.u32 2147483648, %v486_v26  ;;  %vm492_vm11 = vweird.f32 %v486_v26  ;;  %v496_v44 = vand.u32 2147483647, %v486_v26 }
 0x1c9   :  { %v244_v29 = vmul.f32 %v1085_v23, %v243_v27 }
 0x1ca   :  { %v499_v46 = vor.u32 1.1754944e-38, %v498_v43  ;;  %vm497_vm13 = vcmp.eq.f32.partialorder %v496_v44, 8.507059e+37 }
 0x1cb   :  { %v245_v31 = vadd.f32 %v1085_v23, %v244_v29  ;;  %v619_v24 = vpop.permute.xlu2 %618 }
 0x1cc   :  { %639 = vmatpush.msra.mxu0 %v619_v24 }
 0x1cd   :  { %v249_v33 = vsel %vm248_vm8, %v1085_v23, %v245_v31  ;;  %v781_v23 = vpop.permute.xlu0 %780 }
 0x1ce   :  { %v1087_v34 = vpop.eup %1086  ;;  %v254_v36 = vsel %vm251_vm9, %v253_v32, %v249_v33  ;;  %v779_v25 = vpop.permute.xlu1 %778  ;;  %773 = vmatpush.msrb.mxu0 %v195_v49 }
 0x1cf   :  { %v488_v37 = vmul.f32 %v1087_v34, %v486_v26  ;;  %v255_v38 = vmul.f32 %v1079_v57, %v254_v36  ;;  %vm493_vm10 = vweird.f32 %v1087_v34 }
 0x1d0   :  { %vm494_vm12 = vmor %vm492_vm11, %vm493_vm10 }
 0x1d1   :  { %v489_v40 = vsub.f32 1.0, %v488_v37  ;;  %1030 = vmatmul.msk.f32.vlgmr.msrb.gmra.mxu2 %vm112_vm1, %v255_v38 }
 0x1d2   :  { %523 = vmatpush.msrb.mxu2 %v503_v39 }
 0x1d3   :  { %v490_v41 = vmul.f32 %v1087_v34, %v489_v40  ;;  %v646_v26 = vpop.permute.xlu2 %645 }
 0x1d5   :  { %v491_v42 = vadd.f32 %v1087_v34, %v490_v41  ;;  %v1358_v30 = vpop.permute.xlu0 %889 }
 0x1d6   :  { %v706_v27 = vpop.permute.xlu1 %705 }
 0x1d7   :  { %v495_v45 = vsel %vm494_vm12, %v1087_v34, %v491_v42 }
 0x1d8   :  { %v500_v47 = vsel %vm497_vm13, %v499_v46, %v495_v45 }
 0x1d9   :  { %1034 = vmatmul.msk.f32.vlgmr.msra.gmra.mxu2 %vm112_vm1, %v1301_v16  ;;  %v501_v48 = vmul.f32 %v1083_v4, %v500_v47 }
 0x1da   :  { %1044 = vmatpush.xpose.msk.msra.mxu2 %vm112_vm1, %v648_v21 }
 0x1db   :  { %v1355_v28 = vpop.permute.xlu2 %891 }
 0x1dd   :  { %v950_v31 = vpop.permute.xlu0 %949 }
 0x1e1   :  { %1039 = vmatmul.msk.f32.vlgmr.msrb.gmra.mxu2 %vm112_vm1, %v501_v48 }
 0x1e2   :  { %1049 = vmatpush.xpose.msk.msrb.mxu2 %vm112_vm1, %v781_v23 }
 0x1e3   :  { %v839_v29 = vpop.permute.xlu2 %838 }
 0x1e9   :  { %1045 = vmatmul.msk.f32.vlgmr.msra.gmra.mxu2 %vm112_vm1, %v646_v26 }
 0x1ea   :  { %970 = vmatpush.msra.mxu2 %v950_v31 }
 0x1f1   :  { %1050 = vmatmul.msk.f32.vlgmr.msrb.gmra.mxu2 %vm112_vm1, %v779_v25 }
 0x246   :  { %v192_v50 = vpop.f32.mrf.mxu2 }
 0x247   :  { %1032 = vmatmul.msk.f32.vlgmr.msrb.gmra.mxu3 %vm112_vm1, %v192_v50 }
 0x248   :  { %1041 = vmatpush.xpose.msk.msrb.mxu3 %vm112_vm1, %v561_v20 }
 0x254   :  { %v279_v51 = vpop.f32.mrf.mxu2 }
 0x255   :  { %1031 = vmatmul.msk.f32.vlgmr.msrb.gmra.mxu1 %vm112_vm1, %v279_v51 }
 0x256   :  { %548 = vmatpush.msrb.mxu1 %v1346_v63 }
 0x25c   :  { %v355_v52 = vpop.f32.mrf.mxu2 }
 0x25d   :  { %v358_v53 = vsel %vm112_vm1, %v355_v52, -inf }
 0x25e   :  { %v359_v54 = vrot.slane %v358_v53, 4 }
 0x260   :  { %v360_v55 = vmax.f32 %v358_v53, %v359_v54 }
 0x262   :  { %v361_v16 = vrot.slane %v360_v55, 2 }
 0x264   :  { %v362_v56 = vmax.f32 %v360_v55, %v361_v16  ;;  %v525_v19 = vpop.f32.mrf.mxu2 }
 0x266   :  { %v363_v57 = vrot.slane %v362_v56, 1 }
 0x268   :  { %v364_v58 = vmax.f32 %v362_v56, %v363_v57 }
 0x26a   :  { %v365_v59 = vsub.f32 %v355_v52, %v364_v58 }
 0x26c   :  { %v366_v60 = vmul.f32 1.442695, %v365_v59  ;;  %v670_v34 = vpop.f32.mrf.mxu2 }
 0x26d   :  { %v673_v36 = vsel %vm112_vm1, %v670_v34, -inf }
 0x26e   :  { %1088 = vpow2.f32 %v366_v60  ;;  %v674_v37 = vrot.slane %v673_v36, 4 }
 0x270   :  { %v675_v38 = vmax.f32 %v673_v36, %v674_v37  ;;  %v1376_v36 = vld [vmem:[%s1407_s4] ss:$0 sm:$0xff]  ;;  %s1226_s4 = smov [#allocation8]  }
 0x271   :  { %s1007_s21 = sshll.u32 %s1226_s4, 4  ;;  %s1008_s21 = int_to_ptr.vmem [resolvable:$true] %s1007_s21 }
 0x272   :  { %v676_v39 = vrot.slane %v675_v38, 2 }
 0x274   :  { %v1089_v61 = vpop.eup %1088  ;;  %v677_v40 = vmax.f32 %v675_v38, %v676_v39  ;;  %v803_v45 = vpop.f32.mrf.mxu2 }
 0x275   :  { %v368_v62 = vsel %vm112_vm1, %v1089_v61, 0.0 }
 0x276   :  { %v369_v0 = vrot.slane %v368_v62, 4  ;;  %v678_v41 = vrot.slane %v677_v40, 1 }
 0x278   :  { %v370_v1 = vadd.f32 %v369_v0, %v368_v62  ;;  %v679_v42 = vmax.f32 %v677_v40, %v678_v41 }
 0x27a   :  { %v371_v2 = vrot.slane %v370_v1, 2  ;;  %v680_v43 = vsub.f32 %v670_v34, %v679_v42 }
 0x27c   :  { %v372_v3 = vadd.f32 %v371_v2, %v370_v1  ;;  %v681_v44 = vmul.f32 1.442695, %v680_v43 }
 0x27e   :  { %v373_v4 = vrot.slane %v372_v3, 1 }
 0x280   :  { %v374_v5 = vadd.f32 %v373_v4, %v372_v3 }
 0x282   :  { %1090 = vrcp.f32 %v374_v5  ;;  %v386_v9 = vand.u32 2147483648, %v374_v5  ;;  %v384_v12 = vand.u32 2147483647, %v374_v5  ;;  %vm380_vm15 = vweird.f32 %v374_v5 }
 0x283   :  { %1092 = vpow2.f32 %v681_v44 }
 0x284   :  { %v387_v14 = vor.u32 1.1754944e-38, %v386_v9  ;;  %vm385_vm3 = vcmp.eq.f32.partialorder %v384_v12, 8.507059e+37 }
 0x288   :  { %v1091_v6 = vpop.eup %1090 }
 0x289   :  { %v376_v7 = vmul.f32 %v1091_v6, %v374_v5  ;;  %vm381_vm14 = vweird.f32 %v1091_v6  ;;  %v1093_v46 = vpop.eup %1092 }
 0x28a   :  { %vm382_vm2 = vmor %vm380_vm15, %vm381_vm14  ;;  %v683_v47 = vsel %vm112_vm1, %v1093_v46, 0.0 }
 0x28b   :  { %v377_v8 = vsub.f32 1.0, %v376_v7  ;;  %v684_v48 = vrot.slane %v683_v47, 4 }
 0x28d   :  { %v378_v11 = vmul.f32 %v1091_v6, %v377_v8  ;;  %v685_v50 = vadd.f32 %v684_v48, %v683_v47 }
 0x28f   :  { %v379_v13 = vadd.f32 %v1091_v6, %v378_v11  ;;  %v686_v52 = vrot.slane %v685_v50, 2 }
 0x291   :  { %v383_v15 = vsel %vm382_vm2, %v1091_v6, %v379_v13  ;;  %v687_v54 = vadd.f32 %v686_v52, %v685_v50 }
 0x292   :  { %v388_v17 = vsel %vm385_vm3, %v387_v14, %v383_v15 }
 0x293   :  { %v389_v18 = vmul.f32 %v1089_v61, %v388_v17  ;;  %v688_v16 = vrot.slane %v687_v54, 1 }
 0x295   :  { %1035 = vmatmul.msk.f32.vlgmr.msra.gmra.mxu1 %vm112_vm1, %v389_v18  ;;  %v689_v57 = vadd.f32 %v688_v16, %v687_v54 }
 0x296   :  { %726 = vmatpush.msra.mxu1 %v706_v27 }
 0x297   :  { %1094 = vrcp.f32 %v689_v57  ;;  %v701_v62 = vand.u32 2147483648, %v689_v57  ;;  %vm695_vm4 = vweird.f32 %v689_v57  ;;  %v699_v2 = vand.u32 2147483647, %v689_v57 }
 0x299   :  { %v702_v6 = vor.u32 1.1754944e-38, %v701_v62  ;;  %vm700_vm7 = vcmp.eq.f32.partialorder %v699_v2, 8.507059e+37 }
 0x29d   :  { %1040 = vmatmul.msk.f32.vlgmr.msrb.gmra.mxu1 %vm112_vm1, %v525_v19  ;;  %v1095_v60 = vpop.eup %1094 }
 0x29e   :  { %859 = vmatpush.msrb.mxu1 %v839_v29  ;;  %v691_v61 = vmul.f32 %v1095_v60, %v689_v57  ;;  %vm696_vm5 = vweird.f32 %v1095_v60 }
 0x29f   :  { %vm697_vm6 = vmor %vm695_vm4, %vm696_vm5 }
 0x2a0   :  { %v692_v1 = vsub.f32 1.0, %v691_v61 }
 0x2a2   :  { %v693_v4 = vmul.f32 %v1095_v60, %v692_v1 }
 0x2a4   :  { %v694_v7 = vadd.f32 %v1095_v60, %v693_v4 }
 0x2a6   :  { %v698_v9 = vsel %vm697_vm6, %v1095_v60, %v694_v7 }
 0x2a7   :  { %v703_v12 = vsel %vm700_vm7, %v702_v6, %v698_v9 }
 0x2a8   :  { %v704_v13 = vmul.f32 %v1093_v46, %v703_v12 }
 0x2aa   :  { %1046 = vmatmul.msk.f32.vlgmr.msra.gmra.mxu1 %vm112_vm1, %v704_v13 }
 0x2ab   :  { %994 = vmatpush.msra.mxu1 %v1346_v63 }
 0x2ca   :  { %v327_v23 = vpop.f32.mrf.mxu3 }
 0x2d2   :  { %v1360_v32 = vpop.f32.mrf.mxu1 }
 0x2d3   :  { %v328_v31 = vadd.f32 %v327_v23, %v1360_v32 }
 0x312   :  { %v413_v33 = vpop.f32.mrf.mxu1 }
 0x313   :  { %1036 = vmatmul.msk.f32.vlgmr.msra.gmra.mxu3 %vm112_vm1, %v413_v33 }
 0x314   :  { %750 = vmatpush.msra.mxu3 %v1294_v10  ;;  %v806_v10 = vsel %vm112_vm1, %v803_v45, -inf }
 0x31a   :  { %v550_v37 = vpop.f32.mrf.mxu1 }
 0x31b   :  { %1042 = vmatmul.msk.f32.vlgmr.msrb.gmra.mxu3 %vm112_vm1, %v1308_v35  ;;  %v807_v35 = vrot.slane %v806_v10, 4 }
 0x31c   :  { %883 = vmatpush.msrb.mxu3 %v417_v22 }
 0x31d   :  { %v808_v49 = vmax.f32 %v806_v10, %v807_v35 }
 0x31f   :  { %v809_v51 = vrot.slane %v808_v49, 2 }
 0x321   :  { %v810_v53 = vmax.f32 %v808_v49, %v809_v51 }
 0x323   :  { %v811_v55 = vrot.slane %v810_v53, 1 }
 0x325   :  { %v812_v56 = vmax.f32 %v810_v53, %v811_v55 }
 0x327   :  { %v813_v58 = vsub.f32 %v803_v45, %v812_v56  ;;  %v728_v2 = vpop.f32.mrf.mxu1 }
 0x328   :  { %1047 = vmatmul.msk.f32.vlgmr.msra.gmra.mxu3 %vm112_vm1, %v728_v2 }
 0x329   :  { %v814_v59 = vmul.f32 1.442695, %v813_v58 }
 0x32b   :  { %1096 = vpow2.f32 %v814_v59 }
 0x331   :  { %v1097_v0 = vpop.eup %1096 }
 0x332   :  { %v816_v3 = vsel %vm112_vm1, %v1097_v0, 0.0 }
 0x333   :  { %v817_v5 = vrot.slane %v816_v3, 4 }
 0x335   :  { %v818_v8 = vadd.f32 %v817_v5, %v816_v3 }
 0x337   :  { %v819_v11 = vrot.slane %v818_v8, 2 }
 0x339   :  { %v820_v14 = vadd.f32 %v819_v11, %v818_v8 }
 0x33b   :  { %v821_v15 = vrot.slane %v820_v14, 1 }
 0x33d   :  { %v822_v17 = vadd.f32 %v821_v15, %v820_v14 }
 0x33f   :  { %1098 = vrcp.f32 %v822_v17  ;;  %v834_v20 = vand.u32 2147483648, %v822_v17  ;;  %vm828_vm8 = vweird.f32 %v822_v17  ;;  %v832_v22 = vand.u32 2147483647, %v822_v17 }
 0x341   :  { %v835_v25 = vor.u32 1.1754944e-38, %v834_v20  ;;  %vm833_vm11 = vcmp.eq.f32.partialorder %v832_v22, 8.507059e+37 }
 0x345   :  { %v1099_v18 = vpop.eup %1098 }
 0x346   :  { %v824_v19 = vmul.f32 %v1099_v18, %v822_v17  ;;  %vm829_vm9 = vweird.f32 %v1099_v18 }
 0x347   :  { %vm830_vm10 = vmor %vm828_vm8, %vm829_vm9 }
 0x348   :  { %v825_v21 = vsub.f32 1.0, %v824_v19 }
 0x34a   :  { %v826_v24 = vmul.f32 %v1099_v18, %v825_v21 }
 0x34c   :  { %v827_v26 = vadd.f32 %v1099_v18, %v826_v24 }
 0x34e   :  { %v831_v27 = vsel %vm830_vm10, %v1099_v18, %v827_v26 }
 0x34f   :  { %v836_v29 = vsel %vm833_vm11, %v835_v25, %v831_v27 }
 0x350   :  { %v837_v63 = vmul.f32 %v1097_v0, %v836_v29 }
 0x352   :  { %1051 = vmatmul.msk.f32.vlgmr.msrb.gmra.mxu1 %vm112_vm1, %v837_v63 }
 0x396   :  { %v438_v33 = vpop.f32.mrf.mxu3 }
 0x397   :  { %v441_v34 = vadd.f32 %v438_v33, %v328_v31 }
 0x399   :  { %v553_v38 = vadd.f32 %v550_v37, %v441_v34 }
 0x39b   :  { %v557_v39 = vadd.f32 %v1376_v36, %v553_v38 }
 0x39d   :  { %558 = vst.msk [vmem:[#allocation8] sm:$0xff] %vm78_vm0, %v557_v39 }
 0x39e   :  { %v583_v40 = vpop.f32.mrf.mxu3 }
 0x39f   :  { %v586_v41 = vsel %vm112_vm1, %v583_v40, -inf }
 0x3a0   :  { %v587_v32 = vrot.slane %v586_v41, 4 }
 0x3a2   :  { %v588_v42 = vmax.f32 %v586_v41, %v587_v32 }
 0x3a4   :  { %v589_v43 = vrot.slane %v588_v42, 2 }
 0x3a6   :  { %v590_v44 = vmax.f32 %v588_v42, %v589_v43 }
 0x3a8   :  { %v591_v45 = vrot.slane %v590_v44, 1 }
 0x3aa   :  { %v592_v46 = vmax.f32 %v590_v44, %v591_v45 }
 0x3ac   :  { %v593_v10 = vsub.f32 %v583_v40, %v592_v46  ;;  %v752_v40 = vpop.f32.mrf.mxu3 }
 0x3ae   :  { %v594_v47 = vmul.f32 1.442695, %v593_v10 }
 0x3b0   :  { %1100 = vpow2.f32 %v594_v47 }
 0x3b6   :  { %v1101_v35 = vpop.eup %1100 }
 0x3b7   :  { %v596_v48 = vsel %vm112_vm1, %v1101_v35, 0.0 }
 0x3b8   :  { %v597_v49 = vrot.slane %v596_v48, 4 }
 0x3ba   :  { %v598_v50 = vadd.f32 %v597_v49, %v596_v48 }
 0x3bc   :  { %v599_v51 = vrot.slane %v598_v50, 2 }
 0x3be   :  { %v600_v52 = vadd.f32 %v599_v51, %v598_v50 }
 0x3c0   :  { %v601_v53 = vrot.slane %v600_v52, 1 }
 0x3c2   :  { %v602_v54 = vadd.f32 %v601_v53, %v600_v52 }
 0x3c4   :  { %1102 = vrcp.f32 %v602_v54  ;;  %v614_v57 = vand.u32 2147483648, %v602_v54  ;;  %v612_v59 = vand.u32 2147483647, %v602_v54  ;;  %vm608_vm13 = vweird.f32 %v602_v54 }
 0x3c6   :  { %v615_v61 = vor.u32 1.1754944e-38, %v614_v57  ;;  %vm613_vm15 = vcmp.eq.f32.partialorder %v612_v59, 8.507059e+37 }
 0x3ca   :  { %v1103_v55 = vpop.eup %1102 }
 0x3cb   :  { %v604_v16 = vmul.f32 %v1103_v55, %v602_v54  ;;  %vm609_vm12 = vweird.f32 %v1103_v55 }
 0x3cc   :  { %vm610_vm14 = vmor %vm608_vm13, %vm609_vm12 }
 0x3cd   :  { %v605_v56 = vsub.f32 1.0, %v604_v16 }
 0x3cf   :  { %v606_v58 = vmul.f32 %v1103_v55, %v605_v56  ;;  %v861_v3 = vpop.f32.mrf.mxu1 }
 0x3d0   :  { %1052 = vmatmul.msk.f32.vlgmr.msrb.gmra.mxu3 %vm112_vm1, %v861_v3 }
 0x3d1   :  { %v607_v60 = vadd.f32 %v1103_v55, %v606_v58 }
 0x3d3   :  { %v611_v62 = vsel %vm610_vm14, %v1103_v55, %v607_v60 }
 0x3d4   :  { %v616_v0 = vsel %vm613_vm15, %v615_v61, %v611_v62 }
 0x3d5   :  { %v617_v1 = vmul.f32 %v1101_v35, %v616_v0 }
 0x3d7   :  { %1043 = vmatmul.msk.f32.vlgmr.msra.gmra.mxu0 %vm112_vm1, %v617_v1 }
 0x3d8   :  { %1053 = vmatpush.xpose.msk.msra.mxu0 %vm112_vm1, %v1355_v28 }
 0x453   :  { %v885_v32 = vpop.f32.mrf.mxu3 }
 0x454   :  { %v641_v4 = vpop.f32.mrf.mxu0 }
 0x455   :  { %1048 = vmatmul.msk.f32.vlgmr.msrb.gmra.mxu0 %vm112_vm1, %v641_v4 }
 0x45d   :  { %1054 = vmatmul.msk.f32.vlgmr.msra.gmra.mxu0 %vm112_vm1, %v1358_v30 }
 0x4d2   :  { %v775_v5 = vpop.f32.mrf.mxu0 }
 0x4d3   :  { %v776_v41 = vadd.f32 %v775_v5, %v752_v40 }
 0x4d5   :  { %v888_v42 = vadd.f32 %v885_v32, %v776_v41 }
 0x4da   :  { %v914_v6 = vpop.f32.mrf.mxu0 }
 0x4db   :  { %v917_v7 = vsel %vm112_vm1, %v914_v6, -inf }
 0x4dc   :  { %v918_v8 = vrot.slane %v917_v7, 4 }
 0x4de   :  { %v919_v9 = vmax.f32 %v917_v7, %v918_v8 }
 0x4e0   :  { %v920_v11 = vrot.slane %v919_v9, 2 }
 0x4e2   :  { %v921_v28 = vmax.f32 %v919_v9, %v920_v11 }
 0x4e4   :  { %v922_v12 = vrot.slane %v921_v28, 1 }
 0x4e6   :  { %v923_v13 = vmax.f32 %v921_v28, %v922_v12 }
 0x4e8   :  { %v924_v14 = vsub.f32 %v914_v6, %v923_v13 }
 0x4ea   :  { %v925_v15 = vmul.f32 1.442695, %v924_v14 }
 0x4ec   :  { %1104 = vpow2.f32 %v925_v15 }
 0x4f2   :  { %v1105_v17 = vpop.eup %1104 }
 0x4f3   :  { %v927_v18 = vsel %vm112_vm1, %v1105_v17, 0.0 }
 0x4f4   :  { %v928_v19 = vrot.slane %v927_v18, 4 }
 0x4f6   :  { %v929_v20 = vadd.f32 %v928_v19, %v927_v18 }
 0x4f8   :  { %v930_v21 = vrot.slane %v929_v20, 2 }
 0x4fa   :  { %v931_v30 = vadd.f32 %v930_v21, %v929_v20 }
 0x4fc   :  { %v932_v22 = vrot.slane %v931_v30, 1 }
 0x4fe   :  { %v933_v23 = vadd.f32 %v932_v22, %v931_v30 }
 0x500   :  { %1106 = vrcp.f32 %v933_v23  ;;  %v945_v27 = vand.u32 2147483648, %v933_v23  ;;  %v943_v31 = vand.u32 2147483647, %v933_v23  ;;  %vm939_vm3 = vweird.f32 %v933_v23 }
 0x502   :  { %v946_v33 = vor.u32 1.1754944e-38, %v945_v27  ;;  %vm944_vm5 = vcmp.eq.f32.partialorder %v943_v31, 8.507059e+37 }
 0x506   :  { %v1107_v24 = vpop.eup %1106 }
 0x507   :  { %v935_v25 = vmul.f32 %v1107_v24, %v933_v23  ;;  %vm940_vm2 = vweird.f32 %v1107_v24 }
 0x508   :  { %vm941_vm4 = vmor %vm939_vm3, %vm940_vm2 }
 0x509   :  { %v936_v26 = vsub.f32 1.0, %v935_v25 }
 0x50b   :  { %v937_v29 = vmul.f32 %v1107_v24, %v936_v26 }
 0x50d   :  { %v938_v63 = vadd.f32 %v1107_v24, %v937_v29 }
 0x50f   :  { %v942_v34 = vsel %vm941_vm4, %v1107_v24, %v938_v63 }
 0x510   :  { %v947_v37 = vsel %vm944_vm5, %v946_v33, %v942_v34 }
 0x511   :  { %v948_v38 = vmul.f32 %v1105_v17, %v947_v37 }
 0x513   :  { %1055 = vmatmul.msk.f32.vlgmr.msra.gmra.mxu2 %vm112_vm1, %v948_v38 }
 0x596   :  { %v972_v39 = vpop.f32.mrf.mxu2 }
 0x597   :  { %1056 = vmatmul.msk.f32.vlgmr.msra.gmra.mxu1 %vm112_vm1, %v972_v39 }
 0x614   :  { %v996_v43 = vpop.f32.mrf.mxu1 }
 0x615   :  { %v999_v44 = vadd.f32 %v996_v43, %v888_v42 }
 0x617   :  { %v1000_v45 = vadd.f32 %v1376_v36, %v999_v44 }
 0x619   :  { %1002 = vst.msk [vmem:[#allocation8 + $0x8] sm:$0xff] %vm78_vm0, %v1000_v45 }
 0x61a   :  { %1015 = dma.vmem_to_hbm [thread:$0]  %s1008_s21, 256, %s1010_s24, [#allocation4], %s1211_s26, %s1211_s26, %s1212_s27  }
 0x61b   :  { %1208 = dma.done.wait [#allocation4], 256  }
 0x61c   :  { %1209 = vsyncadd [#allocation4], 4294967040 }
 0x61d   :  { %1020 = vsyncpa [#allocation3], 1 }
 0x61e   :  { %1021 = vsyncpa [#allocation6], 1 }
 0x61f   :  { %1022 = vsyncpa [#allocation4], 1 }

</bundles_post_ra>
